<compile_context>
chip_gen: v6e
topology: v6e:2x2x1
jax: 0.10.0
libtpu: 0.0.40
codegen_flags: <defaults>
</compile_context>

<pallas_src>
import jax
import jax.numpy as jnp
from jax.experimental import pallas as pl
from jax.experimental.pallas import tpu as pltpu

BN_EPS = 1e-5
LANE = 128
NEG_BIG = -1e30


def _round_up(n, m):
    return ((n + m - 1) // m) * m


def _make_kernel(voffs, out_size):
    voffs = tuple(int(v) for v in voffs)
    out_size = int(out_size)

    def kernel(idx_ref, tbl_ref,
               w1_ref, b1_ref, g1_ref, be1_ref,
               w2_ref, b2_ref, g2_ref, be2_ref,
               w3_ref, b3_ref, out_ref):
        B = idx_ref.shape[0]
        Vp = tbl_ref.shape[0]

        # ---- fused embedding gather + concat: multi-hot @ block-diagonal table.
        idx = idx_ref[...]                                         # (B, num_cols) int32
        lane_id = jax.lax.broadcasted_iota(jnp.int32, (B, Vp), 1)  # (B, Vp)
        mh = jnp.zeros((B, Vp), jnp.float32)
        for c, off in enumerate(voffs):                            # unrolled, tiny
            gidx = idx[:, c:c + 1] + off                           # (B, 1) global row id
            mh = mh + (lane_id == gidx).astype(jnp.float32)
        x = jnp.dot(mh.astype(jnp.bfloat16), tbl_ref[...],
                    preferred_element_type=jnp.float32)            # (B, Dp) f32

        # ---- linear + batchnorm(batch stats, folded affine) + relu ----
        def linear_bn_relu(h_in, w_ref, b_ref, g_ref, be_ref):
            h = jnp.dot(h_in.astype(jnp.bfloat16), w_ref[...],
                        preferred_element_type=jnp.float32) + b_ref[...]
            mu = jnp.mean(h, axis=0, keepdims=True)
            var = jnp.mean(h * h, axis=0, keepdims=True) - mu * mu
            scale = g_ref[...] * jax.lax.rsqrt(var + BN_EPS)
            shift = be_ref[...] - mu * scale
            return jnp.maximum(h * scale + shift, 0.0)

        h = linear_bn_relu(x, w1_ref, b1_ref, g1_ref, be1_ref)
        h = linear_bn_relu(h, w2_ref, b2_ref, g2_ref, be2_ref)

        # ---- linear3 + softmax over the real (un-padded) output lanes ----
        logits = jnp.dot(h.astype(jnp.bfloat16), w3_ref[...],
                         preferred_element_type=jnp.float32) + b3_ref[...]
        Np = logits.shape[1]
        col = jax.lax.broadcasted_iota(jnp.int32, (B, Np), 1)
        valid = col < out_size
        logits = jnp.where(valid, logits, NEG_BIG)
        m = jnp.max(logits, axis=1, keepdims=True)
        e = jnp.where(valid, jnp.exp(logits - m), 0.0)
        denom = jnp.sum(e, axis=1, keepdims=True)
        out_ref[...] = e * pl.reciprocal(denom, approx=True)

    return kernel


def prepare_params(params, emb_size_dict, output_size):
    """One-time padding/packing/casting of torch-layout params for the kernel."""
    vocabs = [v for v, _ in emb_size_dict]
    dims = [d for _, d in emb_size_dict]
    V, D = sum(vocabs), sum(dims)
    H = params["w1"].shape[1]
    Vp = _round_up(V, LANE)
    Dp = _round_up(D, LANE)
    Hp = _round_up(H, LANE)
    Np = _round_up(output_size, LANE)

    # Block-diagonal concatenated embedding table: column i's table occupies
    # rows [voff_i, voff_i+vocab_i) and cols [doff_i, doff_i+dim_i); zeros elsewhere.
    table = jnp.zeros((Vp, Dp), jnp.float32)
    voffs, voff, doff = [], 0, 0
    for tbl, (v, d) in zip(params["emb_tables"], emb_size_dict):
        table = table.at[voff:voff + v, doff:doff + d].set(tbl)
        voffs.append(voff)
        voff += v
        doff += d

    def pad2(a, shape):
        return jnp.pad(a, [(0, t - s) for s, t in zip(a.shape, shape)])

    return {
        "voffs": tuple(voffs),
        "out_size": int(output_size),
        "table": table.astype(jnp.bfloat16),
        "w1": pad2(params["w1"], (Dp, Hp)).astype(jnp.bfloat16),
        "b1": pad2(params["b1"], (1, Hp)),
        "g1": pad2(params["g1"], (1, Hp)),
        "be1": pad2(params["be1"], (1, Hp)),
        "w2": pad2(params["w2"], (Hp, Hp)).astype(jnp.bfloat16),
        "b2": pad2(params["b2"], (1, Hp)),
        "g2": pad2(params["g2"], (1, Hp)),
        "be2": pad2(params["be2"], (1, Hp)),
        "w3": pad2(params["w3"], (Hp, Np)).astype(jnp.bfloat16),
        "b3": pad2(params["b3"], (1, Np)),
    }


def embed_model_forward(inputs, prep):
    """inputs: (B, num_cols) int32 categorical indices; prep from prepare_params()."""
    B = inputs.shape[0]
    Np = prep["w3"].shape[1]
    kernel = _make_kernel(prep["voffs"], prep["out_size"])
    vmem = pl.BlockSpec(memory_space=pltpu.MemorySpace.VMEM)
    out_padded = pl.pallas_call(
        kernel,
        out_shape=jax.ShapeDtypeStruct((B, Np), jnp.float32),
        in_specs=[vmem] * 12,
        out_specs=vmem,
    )(inputs.astype(jnp.int32), prep["table"],
      prep["w1"], prep["b1"], prep["g1"], prep["be1"],
      prep["w2"], prep["b2"], prep["g2"], prep["be2"],
      prep["w3"], prep["b3"])
    return out_padded[:, :prep["out_size"]]


def reference_forward(inputs, params):
    """Pure-JAX f32 reference with the original (unpadded) parameters."""
    parts = [tbl[inputs[:, i]] for i, tbl in enumerate(params["emb_tables"])]
    x = jnp.concatenate(parts, axis=1).astype(jnp.float32)

    def lbr(h, w, b, g, be):
        h = h @ w + b
        mu = jnp.mean(h, axis=0, keepdims=True)
        var = jnp.mean((h - mu) ** 2, axis=0, keepdims=True)
        h = (h - mu) * jax.lax.rsqrt(var + BN_EPS) * g + be
        return jnp.maximum(h, 0.0)

    h = lbr(x, params["w1"], params["b1"], params["g1"], params["be1"])
    h = lbr(h, params["w2"], params["b2"], params["g2"], params["be2"])
    logits = h @ params["w3"] + params["b3"]
    return jax.nn.softmax(logits, axis=1)


def init_params(key, emb_size_dict, output_size):
    num_of_embs = sum(y for _, y in emb_size_dict)
    keys = jax.random.split(key, len(emb_size_dict) + 3)

    emb_tables = [
        jax.random.normal(keys[i], (vocab, dim), dtype=jnp.float32)
        for i, (vocab, dim) in enumerate(emb_size_dict)
    ]

    def linear_init(k, fan_in, fan_out):
        kw, kb = jax.random.split(k)
        bound = 1.0 / jnp.sqrt(fan_in)
        w = jax.random.uniform(kw, (fan_in, fan_out), jnp.float32, -bound, bound)
        b = jax.random.uniform(kb, (1, fan_out), jnp.float32, -bound, bound)
        return w, b

    w1, b1 = linear_init(keys[-3], num_of_embs, 200)
    w2, b2 = linear_init(keys[-2], 200, 200)
    w3, b3 = linear_init(keys[-1], 200, output_size)

    return {
        "emb_tables": emb_tables,
        "w1": w1, "b1": b1,
        "g1": jnp.ones((1, 200), jnp.float32), "be1": jnp.zeros((1, 200), jnp.float32),
        "w2": w2, "b2": b2,
        "g2": jnp.ones((1, 200), jnp.float32), "be2": jnp.zeros((1, 200), jnp.float32),
        "w3": w3, "b3": b3,
    }


if __name__ == "__main__":
    key = jax.random.PRNGKey(0)

    # (vocab_size, emb_dim) pairs, like emb_size_dict in the torch module.
    emb_size_dict = [(11, 8), (23, 16), (7, 8)]   # num_of_embs = 32
    output_size = 10
    batch = 8

    k_params, k_inp = jax.random.split(key)
    params = init_params(k_params, emb_size_dict, output_size)
    prep = prepare_params(params, emb_size_dict, output_size)

    cols = []
    for i, (vocab, _) in enumerate(emb_size_dict):
        cols.append(jax.random.randint(jax.random.fold_in(k_inp, i),
                                       (batch,), 0, vocab, dtype=jnp.int32))
    inputs = jnp.stack(cols, axis=1)  # (batch, num_cols) int32

    out = embed_model_forward(inputs, prep)
    out = jax.block_until_ready(out)

    assert out.shape == (batch, output_size)
    assert bool(jnp.all(jnp.isfinite(out)))
    # softmax rows sum to ~1 (approx reciprocal -> loose tolerance)
    assert bool(jnp.allclose(jnp.sum(out, axis=1), 1.0, atol=1e-2))
    # matches the f32 pure-JAX reference within bf16-matmul tolerance
    ref = reference_forward(inputs, params)
    assert bool(jnp.allclose(out, ref, atol=5e-2))
    print("KERNEL_OK")
</pallas_src>

<mosaic_0001>
module attributes {stable_mosaic.version = 11 : i64} {
  func.func @kernel(%arg0: memref<8x3xi32, #tpu.memory_space<vmem>>, %arg1: memref<128x128xbf16, #tpu.memory_space<vmem>>, %arg2: memref<128x256xbf16, #tpu.memory_space<vmem>>, %arg3: memref<1x256xf32, #tpu.memory_space<vmem>>, %arg4: memref<1x256xf32, #tpu.memory_space<vmem>>, %arg5: memref<1x256xf32, #tpu.memory_space<vmem>>, %arg6: memref<256x256xbf16, #tpu.memory_space<vmem>>, %arg7: memref<1x256xf32, #tpu.memory_space<vmem>>, %arg8: memref<1x256xf32, #tpu.memory_space<vmem>>, %arg9: memref<1x256xf32, #tpu.memory_space<vmem>>, %arg10: memref<256x128xbf16, #tpu.memory_space<vmem>>, %arg11: memref<1x128xf32, #tpu.memory_space<vmem>>, %arg12: memref<8x128xf32, #tpu.memory_space<vmem>>) attributes {dimension_semantics = [], scalar_prefetch = 0 : i64, scratch_operands = 0 : i64, tpu.core_type = #tpu.core_type<tc>} {
    %c0 = arith.constant 0 : index
    %c0_0 = arith.constant 0 : index
    %0 = vector.load %arg0[%c0, %c0_0] : memref<8x3xi32, #tpu.memory_space<vmem>>, vector<8x3xi32>
    %1 = tpu.iota {dimensions = array<i32: 1>} : vector<8x128xi32>
    %cst = arith.constant 0.000000e+00 : f32
    %2 = vector.broadcast %cst : f32 to vector<8x128xf32>
    %3 = vector.extract_strided_slice %0 {offsets = [0, 0], sizes = [8, 1], strides = [1, 1]} : vector<8x3xi32> to vector<8x1xi32>
    %c0_i32 = arith.constant 0 : i32
    %4 = vector.broadcast %c0_i32 : i32 to vector<8x1xi32>
    %5 = arith.addi %3, %4 : vector<8x1xi32>
    %6 = vector.broadcast %5 : vector<8x1xi32> to vector<8x128xi32>
    %7 = arith.cmpi eq, %1, %6 : vector<8x128xi32>
    %8 = arith.extui %7 : vector<8x128xi1> to vector<8x128xi32>
    %9 = arith.sitofp %8 : vector<8x128xi32> to vector<8x128xf32>
    %10 = arith.addf %2, %9 : vector<8x128xf32>
    %11 = vector.extract_strided_slice %0 {offsets = [0, 1], sizes = [8, 1], strides = [1, 1]} : vector<8x3xi32> to vector<8x1xi32>
    %c11_i32 = arith.constant 11 : i32
    %12 = vector.broadcast %c11_i32 : i32 to vector<8x1xi32>
    %13 = arith.addi %11, %12 : vector<8x1xi32>
    %14 = vector.broadcast %13 : vector<8x1xi32> to vector<8x128xi32>
    %15 = arith.cmpi eq, %1, %14 : vector<8x128xi32>
    %16 = arith.extui %15 : vector<8x128xi1> to vector<8x128xi32>
    %17 = arith.sitofp %16 : vector<8x128xi32> to vector<8x128xf32>
    %18 = arith.addf %10, %17 : vector<8x128xf32>
    %19 = vector.extract_strided_slice %0 {offsets = [0, 2], sizes = [8, 1], strides = [1, 1]} : vector<8x3xi32> to vector<8x1xi32>
    %c34_i32 = arith.constant 34 : i32
    %20 = vector.broadcast %c34_i32 : i32 to vector<8x1xi32>
    %21 = arith.addi %19, %20 : vector<8x1xi32>
    %22 = vector.broadcast %21 : vector<8x1xi32> to vector<8x128xi32>
    %23 = arith.cmpi eq, %1, %22 : vector<8x128xi32>
    %24 = arith.extui %23 : vector<8x128xi1> to vector<8x128xi32>
    %25 = arith.sitofp %24 : vector<8x128xi32> to vector<8x128xf32>
    %26 = arith.addf %18, %25 : vector<8x128xf32>
    %27 = arith.truncf %26 : vector<8x128xf32> to vector<8x128xbf16>
    %c0_1 = arith.constant 0 : index
    %c0_2 = arith.constant 0 : index
    %28 = vector.load %arg1[%c0_1, %c0_2] : memref<128x128xbf16, #tpu.memory_space<vmem>>, vector<128x128xbf16>
    %cst_3 = arith.constant dense<0.000000e+00> : vector<8x128xf32>
    %29 = tpu.matmul %27, %28, %cst_3 {dimension_numbers = #tpu.dot_dimension_numbers<[1], [0], [0], [1], [0, 0, 1, 1], [], []>} : vector<8x128xbf16>, vector<128x128xbf16>, vector<8x128xf32> -> vector<8x128xf32>
    %30 = arith.truncf %29 : vector<8x128xf32> to vector<8x128xbf16>
    %c0_4 = arith.constant 0 : index
    %c0_5 = arith.constant 0 : index
    %31 = vector.load %arg2[%c0_4, %c0_5] : memref<128x256xbf16, #tpu.memory_space<vmem>>, vector<128x256xbf16>
    %cst_6 = arith.constant dense<0.000000e+00> : vector<8x256xf32>
    %32 = tpu.matmul %30, %31, %cst_6 {dimension_numbers = #tpu.dot_dimension_numbers<[1], [0], [0], [1], [0, 0, 1, 1], [], []>} : vector<8x128xbf16>, vector<128x256xbf16>, vector<8x256xf32> -> vector<8x256xf32>
    %c0_7 = arith.constant 0 : index
    %c0_8 = arith.constant 0 : index
    %33 = vector.load %arg3[%c0_7, %c0_8] : memref<1x256xf32, #tpu.memory_space<vmem>>, vector<1x256xf32>
    %34 = vector.broadcast %33 : vector<1x256xf32> to vector<8x256xf32>
    %35 = arith.addf %32, %34 : vector<8x256xf32>
    %cst_9 = arith.constant dense<0.000000e+00> : vector<256xf32>
    %36 = vector.multi_reduction <add>, %35, %cst_9 [0] : vector<8x256xf32> to vector<256xf32>
    %37 = vector.shape_cast %36 : vector<256xf32> to vector<1x256xf32>
    %cst_10 = arith.constant 8.000000e+00 : f32
    %38 = vector.broadcast %cst_10 : f32 to vector<1x256xf32>
    %39 = arith.divf %37, %38 : vector<1x256xf32>
    %40 = arith.mulf %35, %35 : vector<8x256xf32>
    %cst_11 = arith.constant dense<0.000000e+00> : vector<256xf32>
    %41 = vector.multi_reduction <add>, %40, %cst_11 [0] : vector<8x256xf32> to vector<256xf32>
    %42 = vector.shape_cast %41 : vector<256xf32> to vector<1x256xf32>
    %cst_12 = arith.constant 8.000000e+00 : f32
    %43 = vector.broadcast %cst_12 : f32 to vector<1x256xf32>
    %44 = arith.divf %42, %43 : vector<1x256xf32>
    %45 = arith.mulf %39, %39 : vector<1x256xf32>
    %46 = arith.subf %44, %45 : vector<1x256xf32>
    %c0_13 = arith.constant 0 : index
    %c0_14 = arith.constant 0 : index
    %47 = vector.load %arg4[%c0_13, %c0_14] : memref<1x256xf32, #tpu.memory_space<vmem>>, vector<1x256xf32>
    %cst_15 = arith.constant 9.99999974E-6 : f32
    %48 = vector.broadcast %cst_15 : f32 to vector<1x256xf32>
    %49 = arith.addf %46, %48 : vector<1x256xf32>
    %50 = math.rsqrt %49 : vector<1x256xf32>
    %51 = arith.mulf %47, %50 : vector<1x256xf32>
    %c0_16 = arith.constant 0 : index
    %c0_17 = arith.constant 0 : index
    %52 = vector.load %arg5[%c0_16, %c0_17] : memref<1x256xf32, #tpu.memory_space<vmem>>, vector<1x256xf32>
    %53 = arith.mulf %39, %51 : vector<1x256xf32>
    %54 = arith.subf %52, %53 : vector<1x256xf32>
    %55 = vector.broadcast %51 : vector<1x256xf32> to vector<8x256xf32>
    %56 = arith.mulf %35, %55 : vector<8x256xf32>
    %57 = vector.broadcast %54 : vector<1x256xf32> to vector<8x256xf32>
    %58 = arith.addf %56, %57 : vector<8x256xf32>
    %cst_18 = arith.constant 0.000000e+00 : f32
    %59 = vector.broadcast %cst_18 : f32 to vector<8x256xf32>
    %60 = arith.maximumf %58, %59 : vector<8x256xf32>
    %61 = arith.truncf %60 : vector<8x256xf32> to vector<8x256xbf16>
    %c0_19 = arith.constant 0 : index
    %c0_20 = arith.constant 0 : index
    %62 = vector.load %arg6[%c0_19, %c0_20] : memref<256x256xbf16, #tpu.memory_space<vmem>>, vector<256x256xbf16>
    %cst_21 = arith.constant dense<0.000000e+00> : vector<8x256xf32>
    %63 = tpu.matmul %61, %62, %cst_21 {dimension_numbers = #tpu.dot_dimension_numbers<[1], [0], [0], [1], [0, 0, 1, 1], [], []>} : vector<8x256xbf16>, vector<256x256xbf16>, vector<8x256xf32> -> vector<8x256xf32>
    %c0_22 = arith.constant 0 : index
    %c0_23 = arith.constant 0 : index
    %64 = vector.load %arg7[%c0_22, %c0_23] : memref<1x256xf32, #tpu.memory_space<vmem>>, vector<1x256xf32>
    %65 = vector.broadcast %64 : vector<1x256xf32> to vector<8x256xf32>
    %66 = arith.addf %63, %65 : vector<8x256xf32>
    %cst_24 = arith.constant dense<0.000000e+00> : vector<256xf32>
    %67 = vector.multi_reduction <add>, %66, %cst_24 [0] : vector<8x256xf32> to vector<256xf32>
    %68 = vector.shape_cast %67 : vector<256xf32> to vector<1x256xf32>
    %cst_25 = arith.constant 8.000000e+00 : f32
    %69 = vector.broadcast %cst_25 : f32 to vector<1x256xf32>
    %70 = arith.divf %68, %69 : vector<1x256xf32>
    %71 = arith.mulf %66, %66 : vector<8x256xf32>
    %cst_26 = arith.constant dense<0.000000e+00> : vector<256xf32>
    %72 = vector.multi_reduction <add>, %71, %cst_26 [0] : vector<8x256xf32> to vector<256xf32>
    %73 = vector.shape_cast %72 : vector<256xf32> to vector<1x256xf32>
    %cst_27 = arith.constant 8.000000e+00 : f32
    %74 = vector.broadcast %cst_27 : f32 to vector<1x256xf32>
    %75 = arith.divf %73, %74 : vector<1x256xf32>
    %76 = arith.mulf %70, %70 : vector<1x256xf32>
    %77 = arith.subf %75, %76 : vector<1x256xf32>
    %c0_28 = arith.constant 0 : index
    %c0_29 = arith.constant 0 : index
    %78 = vector.load %arg8[%c0_28, %c0_29] : memref<1x256xf32, #tpu.memory_space<vmem>>, vector<1x256xf32>
    %cst_30 = arith.constant 9.99999974E-6 : f32
    %79 = vector.broadcast %cst_30 : f32 to vector<1x256xf32>
    %80 = arith.addf %77, %79 : vector<1x256xf32>
    %81 = math.rsqrt %80 : vector<1x256xf32>
    %82 = arith.mulf %78, %81 : vector<1x256xf32>
    %c0_31 = arith.constant 0 : index
    %c0_32 = arith.constant 0 : index
    %83 = vector.load %arg9[%c0_31, %c0_32] : memref<1x256xf32, #tpu.memory_space<vmem>>, vector<1x256xf32>
    %84 = arith.mulf %70, %82 : vector<1x256xf32>
    %85 = arith.subf %83, %84 : vector<1x256xf32>
    %86 = vector.broadcast %82 : vector<1x256xf32> to vector<8x256xf32>
    %87 = arith.mulf %66, %86 : vector<8x256xf32>
    %88 = vector.broadcast %85 : vector<1x256xf32> to vector<8x256xf32>
    %89 = arith.addf %87, %88 : vector<8x256xf32>
    %cst_33 = arith.constant 0.000000e+00 : f32
    %90 = vector.broadcast %cst_33 : f32 to vector<8x256xf32>
    %91 = arith.maximumf %89, %90 : vector<8x256xf32>
    %92 = arith.truncf %91 : vector<8x256xf32> to vector<8x256xbf16>
    %c0_34 = arith.constant 0 : index
    %c0_35 = arith.constant 0 : index
    %93 = vector.load %arg10[%c0_34, %c0_35] : memref<256x128xbf16, #tpu.memory_space<vmem>>, vector<256x128xbf16>
    %cst_36 = arith.constant dense<0.000000e+00> : vector<8x128xf32>
    %94 = tpu.matmul %92, %93, %cst_36 {dimension_numbers = #tpu.dot_dimension_numbers<[1], [0], [0], [1], [0, 0, 1, 1], [], []>} : vector<8x256xbf16>, vector<256x128xbf16>, vector<8x128xf32> -> vector<8x128xf32>
    %c0_37 = arith.constant 0 : index
    %c0_38 = arith.constant 0 : index
    %95 = vector.load %arg11[%c0_37, %c0_38] : memref<1x128xf32, #tpu.memory_space<vmem>>, vector<1x128xf32>
    %96 = vector.broadcast %95 : vector<1x128xf32> to vector<8x128xf32>
    %97 = arith.addf %94, %96 : vector<8x128xf32>
    %98 = tpu.iota {dimensions = array<i32: 1>} : vector<8x128xi32>
    %c10_i32 = arith.constant 10 : i32
    %99 = vector.broadcast %c10_i32 : i32 to vector<8x128xi32>
    %100 = arith.cmpi slt, %98, %99 : vector<8x128xi32>
    %cst_39 = arith.constant -1.000000e+30 : f32
    %101 = vector.broadcast %cst_39 : f32 to vector<8x128xf32>
    %102 = arith.select %100, %97, %101 : vector<8x128xi1>, vector<8x128xf32>
    %cst_40 = arith.constant dense<0xFF800000> : vector<8xf32>
    %103 = vector.multi_reduction <maximumf>, %102, %cst_40 [1] : vector<8x128xf32> to vector<8xf32>
    %104 = vector.shape_cast %103 : vector<8xf32> to vector<8x1xf32>
    %105 = vector.broadcast %104 : vector<8x1xf32> to vector<8x128xf32>
    %106 = arith.subf %102, %105 : vector<8x128xf32>
    %107 = math.exp %106 : vector<8x128xf32>
    %cst_41 = arith.constant 0.000000e+00 : f32
    %108 = vector.broadcast %cst_41 : f32 to vector<8x128xf32>
    %109 = arith.select %100, %107, %108 : vector<8x128xi1>, vector<8x128xf32>
    %cst_42 = arith.constant dense<0.000000e+00> : vector<8xf32>
    %110 = vector.multi_reduction <add>, %109, %cst_42 [1] : vector<8x128xf32> to vector<8xf32>
    %111 = vector.shape_cast %110 : vector<8xf32> to vector<8x1xf32>
    %112 = tpu.reciprocal %111 {approx = true} : vector<8x1xf32> -> vector<8x1xf32>
    %113 = vector.broadcast %112 : vector<8x1xf32> to vector<8x128xf32>
    %114 = arith.mulf %109, %113 : vector<8x128xf32>
    %c0_43 = arith.constant 0 : index
    %c0_44 = arith.constant 0 : index
    %115 = vector.load %arg12[%c0_43, %c0_44] : memref<8x128xf32, #tpu.memory_space<vmem>>, vector<8x128xf32>
    tpu.vector_store %arg12[%c0_43, %c0_44], %114 {strides = array<i32>} : memref<8x128xf32, #tpu.memory_space<vmem>>, vector<8x128xf32>,
    return
  }
}

</mosaic_0001>

<bundles_post_ra>
// kernel: tpu_custom_call.1
= control target key start
LH: loop header
LB: loop body
LE: loop exit
PB: predicated region body
PF: predicated region fallthrough
CT: control target
= control target key end

     0   :  { %17 = vsyncpa [#allocation3], 0  ;;  %s1590_s0 = inlined_call_operand.vmem [shape: s32[8,3], index: 0, kind: input, shape index: {}]   ;;  %s1591_s1 = inlined_call_operand.hbm [shape: bf16[128,128], index: 1, kind: input, shape index: {}]   ;;  %s1592_s2 = inlined_call_operand.hbm [shape: bf16[128,256], index: 2, kind: input, shape index: {}]   ;;  %s1593_s3 = inlined_call_operand.vmem [shape: f32[1,256], index: 3, kind: input, shape index: {}]   ;;  %s1594_s4 = inlined_call_operand.vmem [shape: f32[1,256], index: 4, kind: input, shape index: {}]   ;;  %s1595_s5 = inlined_call_operand.vmem [shape: f32[1,256], index: 5, kind: input, shape index: {}]   ;;  %s1596_s6 = inlined_call_operand.hbm [shape: bf16[256,256], index: 6, kind: input, shape index: {}]   ;;  %s1597_s7 = inlined_call_operand.vmem [shape: f32[1,256], index: 7, kind: input, shape index: {}]   ;;  %s1598_s8 = inlined_call_operand.vmem [shape: f32[1,256], index: 8, kind: input, shape index: {}]   ;;  %s1599_s9 = inlined_call_operand.vmem [shape: f32[1,256], index: 9, kind: input, shape index: {}]   ;;  %s1600_s10 = inlined_call_operand.hbm [shape: bf16[256,128], index: 10, kind: input, shape index: {}]   ;;  %s1601_s11 = inlined_call_operand.vmem [shape: f32[1,128], index: 11, kind: input, shape index: {}]   ;;  %s1602_s12 = inlined_call_operand.hbm [shape: f32[8,128], index: 12, kind: output, shape index: {}]  }
   0x1   :  { %18 = vsyncpa [#allocation6], 0 }
   0x2   :  { %19 = vsyncpa [#allocation9], 0 }
   0x3   :  { %20 = vsyncpa [#allocation4], 0  ;;  %s1412_s21 = smov [#allocation5]  }
   0x4   :  { %s40_s22 = sshll.u32 %s1412_s21, 4  ;;  %s41_s22 = int_to_ptr.vmem [resolvable:$true] %s40_s22 }
   0x5   :  { %s1312_s23 = scalar_lea.vmem %s41_s22, 2048  ;;  %p1317_p1 = scmp.lt.s32.totalorder %s41_s22, %s41_s22 }
   0x6   :  { %p1313_p0 = scmp.ne.s32.totalorder %s41_s22, %s1312_s23  ;;  %p1318_p2 = scmp.lt.s32.totalorder %s1312_s23, %s1312_s23 }
   0x8   :  { %p1319_p3 = por %p1318_p2, %p1317_p1 }
   0xa   :  { %p1320_p4 = pnand %p1319_p3, %p1313_p0 }
   0xc   :  { %1323 = shalt.err (!%p1320_p4)
}
   0xd   :  { %s1413_s24 = smov 128   ;;  %s1414_s25 = smov 8  }
   0xe   :  { %46 = dma.hbm_to_vmem [thread:$0]  %s1592_s2, 2048, %s41_s22, [#allocation6], %s1413_s24, %s1413_s24, %s1414_s25  }
   0xf   :  { %s1415_s28 = smov [#allocation2]  }
  0x10   :  { %s28_s29 = sshll.u32 %s1415_s28, 4  ;;  %s29_s29 = int_to_ptr.vmem [resolvable:$true] %s28_s29 }
  0x11   :  { %s1332_s30 = scalar_lea.vmem %s29_s29, 1024  ;;  %p1337_p6 = scmp.lt.s32.totalorder %s29_s29, %s29_s29 }
  0x12   :  { %p1333_p5 = scmp.ne.s32.totalorder %s29_s29, %s1332_s30  ;;  %p1338_p7 = scmp.lt.s32.totalorder %s1332_s30, %s1332_s30 }
  0x14   :  { %p1339_p8 = por %p1338_p7, %p1337_p6 }
  0x16   :  { %p1340_p9 = pnand %p1339_p8, %p1333_p5 }
  0x18   :  { %1343 = shalt.err (!%p1340_p9)
}
  0x19   :  { %s1416_s13 = smov 64   ;;  %s1417_s14 = smov 4  }
  0x1a   :  { %34 = dma.hbm_to_vmem [thread:$0]  %s1591_s1, 1024, %s29_s29, [#allocation3], %s1416_s13, %s1416_s13, %s1417_s14  }
  0x1b   :  { %s1418_s17 = smov [#allocation7]   ;;  %s1419_s19 = smov [#allocation8]  }
  0x1c   :  { %s58_s18 = sshll.u32 %s1418_s17, 4  ;;  %s76_s2 = sshll.u32 %s1419_s19, 4  ;;  %s59_s18 = int_to_ptr.vmem [resolvable:$true] %s58_s18  ;;  %s77_s2 = int_to_ptr.vmem [resolvable:$true] %s76_s2 }
  0x1d   :  { %s1352_s20 = scalar_lea.vmem %s59_s18, 4096  ;;  %p1357_p11 = scmp.lt.s32.totalorder %s59_s18, %s59_s18 }
  0x1e   :  { %p1353_p10 = scmp.ne.s32.totalorder %s59_s18, %s1352_s20  ;;  %p1358_p12 = scmp.lt.s32.totalorder %s1352_s20, %s1352_s20 }
  0x20   :  { %p1359_p13 = por %p1358_p12, %p1357_p11 }
  0x22   :  { %p1360_p0 = pnand %p1359_p13, %p1353_p10 }
  0x24   :  { %1363 = shalt.err (!%p1360_p0)
}
  0x25   :  { %64 = dma.hbm_to_vmem [thread:$0]  %s1596_s6, 4096, %s59_s18, [#allocation6], %s1413_s24, %s1413_s24, %s1414_s25  }
  0x26   :  { %s1372_s1 = scalar_lea.vmem %s77_s2, 2048  ;;  %p1377_p2 = scmp.lt.s32.totalorder %s77_s2, %s77_s2 }
  0x27   :  { %p1373_p1 = scmp.ne.s32.totalorder %s77_s2, %s1372_s1  ;;  %p1378_p3 = scmp.lt.s32.totalorder %s1372_s1, %s1372_s1 }
  0x29   :  { %p1379_p4 = por %p1378_p3, %p1377_p2 }
  0x2b   :  { %p1380_p5 = pnand %p1379_p4, %p1373_p1 }
  0x2d   :  { %1383 = shalt.err (!%p1380_p5)
}
  0x2e   :  { %82 = dma.hbm_to_vmem [thread:$0]  %s1600_s10, 2048, %s77_s2, [#allocation9], %s1416_s13, %s1416_s13, %s1417_s14  }
  0x2f   :  { %1404 = dma.done.wait [#allocation3], 1024  }
  0x30   :  { %1405 = vsyncadd [#allocation3], 4294966272 }
  0x31   :  { %1406 = dma.done.wait [#allocation6], 6144  }
  0x32   :  { %1407 = vsyncadd [#allocation6], 4294961152 }
  0x33   :  { %1408 = dma.done.wait [#allocation9], 2048  }
  0x34   :  { %1409 = vsyncadd [#allocation9], 4294965248  ;;  %v1420_v0 = vmov 0   ;;  %v1421_v1 = vmov 2   ;;  %v1422_v2 = vmov 0.0   ;;  %v98_v3 = vld [vmem:[%s1590_s0] sm:$0xff]  ;;  %v99_v30 = vlaneseq }
  0x35   :  { %1192 = vset.pattern.permute.xlu0 %v1420_v0  ;;  %1194 = vset.pattern.permute.xlu1 %v1421_v1  ;;  %v108_v4 = vadd.s32 11, %v98_v3  ;;  %v116_v5 = vadd.s32 34, %v98_v3  ;;  %v1196_v6 = vld [vmem:[#allocation2 + $0x38] sm:$0xff]   ;;  %v1197_v7 = vld [vmem:[#allocation2 + $0x30] sm:$0xff]   ;;  %v1423_v8 = vmov 1   ;;  %v1198_v9 = vld [vmem:[#allocation2 + $0x28] sm:$0xff]  }
  0x36   :  { %1157 = vmatprep.subr.bf16.mxu0 %v1422_v2  ;;  %370 = vmatprep.mubr.bf16.mxu1 %v1420_v0  ;;  %vm1424_vm0 = vmmov 0   ;;  %v1204_v10 = vld [vmem:[#allocation5 + $0x74] ss:$8 sps:$4 sm:$0xff]   ;;  %v1206_v11 = vld [vmem:[#allocation5 + $0x70] ss:$8 sps:$4 sm:$0xff]   ;;  %v1199_v13 = vld [vmem:[#allocation2 + $0x20] sm:$0xff]  }
  0x37   :  { %102 = vperm.xlu0 %1192, %v98_v3   ;;  %118 = vperm.xlu1 %1194, %v116_v5   ;;  %v1207_v12 = vld [vmem:[#allocation5 + $0x64] ss:$8 sps:$4 sm:$0xff]   ;;  %v1209_v14 = vld [vmem:[#allocation5 + $0x60] ss:$8 sps:$4 sm:$0xff]   ;;  %v1210_v15 = vld [vmem:[#allocation5 + $0x54] ss:$8 sps:$4 sm:$0xff]  }
  0x38   :  { %1158 = vmatpush3.bf16.msra.mxu0 %v1196_v6  ;;  %1173 = vmatprep.mubr.msk.bf16.mxu0 %vm1424_vm0, %v1422_v2  ;;  %v1200_v16 = vld [vmem:[#allocation2 + $0x18] sm:$0xff]   ;;  %v1201_v17 = vld [vmem:[#allocation2 + $0x10] sm:$0xff]   ;;  %v1213_v19 = vld [vmem:[#allocation5 + $0x44] ss:$8 sps:$4 sm:$0xff]   ;;  %v1523_v31 = vand.u32 127, %v99_v30  ;;  %s1426_s14 = smov [#allocation10]  }
  0x39   :  { %1159 = vmatprep.subr.bf16.mxu0 %v1422_v2  ;;  %338 = vmatprep.subr.bf16.mxu1 %v1204_v10  ;;  %v1212_v18 = vld [vmem:[#allocation5 + $0x50] ss:$8 sps:$4 sm:$0xff]   ;;  %v1215_v20 = vld [vmem:[#allocation5 + $0x40] ss:$8 sps:$4 sm:$0xff]   ;;  %v1216_v21 = vld [vmem:[#allocation5 + $0x34] ss:$8 sps:$4 sm:$0xff]  }
  0x3a   :  { %339 = vmatpush1.bf16.msra.mxu1 %v1206_v11  ;;  %v1202_v22 = vld [vmem:[#allocation2 + $0x8] sm:$0xff]   ;;  %v1218_v23 = vld [vmem:[#allocation5 + $0x30] ss:$8 sps:$4 sm:$0xff]   ;;  %v1203_v25 = vld [vmem:[#allocation2] sm:$0xff]   ;;  %vm1020_vm4 = vcmp.lt.s32.totalorder %v1523_v31, 10  ;;  %s1039_s15 = sshll.u32 %s1426_s14, 4  ;;  %s1040_s15 = int_to_ptr.vmem [resolvable:$true] %s1039_s15 }
  0x3b   :  { %1193 = vset.pattern.permute.xlu0 %v1423_v8  ;;  %340 = vmatprep.subr.bf16.mxu1 %v1207_v12  ;;  %v1219_v24 = vld [vmem:[#allocation5 + $0x24] ss:$8 sps:$4 sm:$0xff]   ;;  %v1221_v26 = vld [vmem:[#allocation5 + $0x20] ss:$8 sps:$4 sm:$0xff]   ;;  %v1222_v27 = vld [vmem:[#allocation5 + $0x14] ss:$8 sps:$4 sm:$0xff]   ;;  %p1389_p7 = scmp.lt.s32.totalorder %s1040_s15, %s1040_s15 }
  0x3c   :  { %110 = vperm.xlu0 %1193, %v108_v4   ;;  %1160 = vmatpush3.bf16.msra.mxu0 %v1197_v7  ;;  %v1224_v28 = vld [vmem:[#allocation5 + $0x10] ss:$8 sps:$4 sm:$0xff]   ;;  %v1225_v29 = vld [vmem:[#allocation5 + $0x4] ss:$8 sps:$4 sm:$0xff]   ;;  %v1227_v41 = vld [vmem:[#allocation5] ss:$8 sps:$4 sm:$0xff]  }
  0x3d   :  { %1161 = vmatprep.subr.bf16.mxu0 %v1422_v2  ;;  %v1230_v47 = vld [vmem:[#allocation7 + $0x74] ss:$8 sps:$4 sm:$0xff]   ;;  %v1228_v48 = vld [vmem:[#allocation7 + $0x70] ss:$8 sps:$4 sm:$0xff]   ;;  %v1233_v49 = vld [vmem:[#allocation7 + $0x64] ss:$8 sps:$4 sm:$0xff]  }
  0x3e   :  { %341 = vmatpush1.bf16.msra.mxu1 %v1209_v14  ;;  %v1231_v50 = vld [vmem:[#allocation7 + $0x60] ss:$8 sps:$4 sm:$0xff]   ;;  %v1236_v51 = vld [vmem:[#allocation7 + $0x54] ss:$8 sps:$4 sm:$0xff]   ;;  %v1234_v52 = vld [vmem:[#allocation7 + $0x50] ss:$8 sps:$4 sm:$0xff]  }
  0x3f   :  { %342 = vmatprep.subr.bf16.mxu1 %v1210_v15  ;;  %v1239_v53 = vld [vmem:[#allocation7 + $0x44] ss:$8 sps:$4 sm:$0xff]   ;;  %v1237_v54 = vld [vmem:[#allocation7 + $0x40] ss:$8 sps:$4 sm:$0xff]   ;;  %v1242_v55 = vld [vmem:[#allocation7 + $0x34] ss:$8 sps:$4 sm:$0xff]  }
  0x40   :  { %1195 = vset.pattern.permute.xlu0 %v1421_v1  ;;  %1162 = vmatpush3.bf16.msra.mxu0 %v1198_v9  ;;  %v1240_v56 = vld [vmem:[#allocation7 + $0x30] ss:$8 sps:$4 sm:$0xff]   ;;  %v1245_v57 = vld [vmem:[#allocation7 + $0x24] ss:$8 sps:$4 sm:$0xff]   ;;  %v1243_v58 = vld [vmem:[#allocation7 + $0x20] ss:$8 sps:$4 sm:$0xff]  }
  0x41   :  { %1163 = vmatprep.subr.bf16.mxu0 %v1422_v2  ;;  %v1248_v59 = vld [vmem:[#allocation7 + $0x14] ss:$8 sps:$4 sm:$0xff]   ;;  %v1246_v60 = vld [vmem:[#allocation7 + $0x10] ss:$8 sps:$4 sm:$0xff]   ;;  %v1251_v61 = vld [vmem:[#allocation7 + $0x4] ss:$8 sps:$4 sm:$0xff]  }
  0x42   :  { %343 = vmatpush1.bf16.msra.mxu1 %v1212_v18  ;;  %v1249_v62 = vld [vmem:[#allocation7] ss:$8 sps:$4 sm:$0xff]   ;;  %v1254_v63 = vld [vmem:[#allocation7 + $0xf4] ss:$8 sps:$4 sm:$0xff]   ;;  %v1252_v0 = vld [vmem:[#allocation7 + $0xf0] ss:$8 sps:$4 sm:$0xff]  }
  0x43   :  { %344 = vmatprep.subr.bf16.mxu1 %v1213_v19  ;;  %v1257_v1 = vld [vmem:[#allocation7 + $0xe4] ss:$8 sps:$4 sm:$0xff]   ;;  %v1260_v3 = vld [vmem:[#allocation7 + $0xd4] ss:$8 sps:$4 sm:$0xff]   ;;  %v1258_v4 = vld [vmem:[#allocation7 + $0xd0] ss:$8 sps:$4 sm:$0xff]  }
  0x44   :  { %1164 = vmatpush3.bf16.msra.mxu0 %v1199_v13  ;;  %v1263_v5 = vld [vmem:[#allocation7 + $0xc4] ss:$8 sps:$4 sm:$0xff]   ;;  %v1261_v6 = vld [vmem:[#allocation7 + $0xc0] ss:$8 sps:$4 sm:$0xff]   ;;  %v1266_v7 = vld [vmem:[#allocation7 + $0xb4] ss:$8 sps:$4 sm:$0xff]  }
  0x45   :  { %1165 = vmatprep.subr.bf16.mxu0 %v1422_v2  ;;  %v1264_v8 = vld [vmem:[#allocation7 + $0xb0] ss:$8 sps:$4 sm:$0xff]   ;;  %v1269_v9 = vld [vmem:[#allocation7 + $0xa4] ss:$8 sps:$4 sm:$0xff]   ;;  %v1267_v10 = vld [vmem:[#allocation7 + $0xa0] ss:$8 sps:$4 sm:$0xff]  }
  0x46   :  { %345 = vmatpush1.bf16.msra.mxu1 %v1215_v20  ;;  %v1272_v11 = vld [vmem:[#allocation7 + $0x94] ss:$8 sps:$4 sm:$0xff]   ;;  %v1270_v12 = vld [vmem:[#allocation7 + $0x90] ss:$8 sps:$4 sm:$0xff]   ;;  %v1275_v13 = vld [vmem:[#allocation7 + $0x84] ss:$8 sps:$4 sm:$0xff]  }
  0x47   :  { %346 = vmatprep.subr.bf16.mxu1 %v1216_v21  ;;  %v1273_v14 = vld [vmem:[#allocation7 + $0x80] ss:$8 sps:$4 sm:$0xff]   ;;  %v249_v15 = vshrl.u32 %v99_v30, 7 }
  0x48   :  { %1166 = vmatpush3.bf16.msra.mxu0 %v1200_v16 }
  0x49   :  { %1167 = vmatprep.subr.bf16.mxu0 %v1422_v2  ;;  %v1532_v16 = vsub.s32 0, %v249_v15  ;;  %v1537_v18 = vsub.s32 1, %v249_v15 }
  0x4a   :  { %347 = vmatpush1.bf16.msra.mxu1 %v1218_v23 }
  0x4b   :  { %348 = vmatprep.subr.bf16.mxu1 %v1219_v24 }
  0x4c   :  { %1168 = vmatpush3.bf16.msra.mxu0 %v1201_v17  ;;  %v246_v17 = vld [vmem:[%s1593_s3] sm:$0x3] }
  0x4d   :  { %1169 = vmatprep.subr.bf16.mxu0 %v1422_v2  ;;  %v251_v19 = vrot.slane %v246_v17, %v1532_v16  ;;  %v255_v20 = vrot.slane %v246_v17, %v1537_v18 }
  0x4e   :  { %349 = vmatpush1.bf16.msra.mxu1 %v1221_v26 }
  0x4f   :  { %350 = vmatprep.subr.bf16.mxu1 %v1222_v27 }
  0x50   :  { %1170 = vmatpush3.bf16.msra.mxu0 %v1202_v22 }
  0x51   :  { %1171 = vmatprep.subr.bf16.mxu0 %v1422_v2 }
  0x52   :  { %351 = vmatpush1.bf16.msra.mxu1 %v1224_v28 }
  0x53   :  { %352 = vmatprep.subr.bf16.mxu1 %v1225_v29 }
  0x54   :  { %1172 = vmatpush3.bf16.msra.mxu0 %v1203_v25 }
  0x55   :  { %694 = vmatprep.subr.bf16.mxu0 %v1230_v47 }
  0x56   :  { %353 = vmatpush1.bf16.msra.mxu1 %v1227_v41 }
  0xb2   :  { %v103_v32 = vpop.permute.xlu0 %102  ;;  %v119_v33 = vpop.permute.xlu1 %118 }
  0xb3   :  { %vm104_vm1 = vcmp.eq.s32.totalorder %v1523_v31, %v103_v32  ;;  %vm120_vm2 = vcmp.eq.s32.totalorder %v1523_v31, %v119_v33 }
  0xb4   :  { %v1050_v35 = vsel %vm104_vm1, 1.0, %v1422_v2  ;;  %v1052_v37 = vsel %vm120_vm2, 1.0, %v1422_v2 }
  0xb7   :  { %v111_v34 = vpop.permute.xlu0 %110 }
  0xb8   :  { %vm112_vm3 = vcmp.eq.s32.totalorder %v1523_v31, %v111_v34 }
  0xb9   :  { %v1051_v36 = vsel %vm112_vm3, 1.0, %v1422_v2  ;;  %v1255_v2 = vld [vmem:[#allocation7 + $0xe0] ss:$8 sps:$4 sm:$0xff]  }
  0xba   :  { %v115_v38 = vadd.f32 %v1051_v36, %v1050_v35 }
  0xbc   :  { %v123_v39 = vadd.f32 %v1052_v37, %v115_v38 }
  0xbe   :  { %v124_v40 = vpack.c.bf16 %v123_v39, %v123_v39 }
  0xc0   :  { %1174 = vmatmul.mubr.bf16.vlgmr.msra.gmra.mxu0 %v124_v40 }
  0xc1   :  { %695 = vmatpush1.bf16.msra.mxu0 %v1228_v48 }
  0xc2   :  { %696 = vmatprep.subr.bf16.mxu0 %v1233_v49 }
  0xc5   :  { %697 = vmatpush1.bf16.msra.mxu0 %v1231_v50 }
  0xc6   :  { %698 = vmatprep.subr.bf16.mxu0 %v1236_v51 }
  0xc9   :  { %699 = vmatpush1.bf16.msra.mxu0 %v1234_v52 }
  0xca   :  { %700 = vmatprep.subr.bf16.mxu0 %v1239_v53 }
  0xcd   :  { %701 = vmatpush1.bf16.msra.mxu0 %v1237_v54 }
  0xce   :  { %702 = vmatprep.subr.bf16.mxu0 %v1242_v55 }
  0xd1   :  { %703 = vmatpush1.bf16.msra.mxu0 %v1240_v56 }
  0xd2   :  { %704 = vmatprep.subr.bf16.mxu0 %v1245_v57 }
  0xd5   :  { %705 = vmatpush1.bf16.msra.mxu0 %v1243_v58 }
  0xd6   :  { %706 = vmatprep.subr.bf16.mxu0 %v1248_v59 }
  0xd9   :  { %707 = vmatpush1.bf16.msra.mxu0 %v1246_v60 }
  0xda   :  { %708 = vmatprep.subr.bf16.mxu0 %v1251_v61 }
  0xdd   :  { %709 = vmatpush1.bf16.msra.mxu0 %v1249_v62 }
  0xde   :  { %710 = vmatprep.subr.bf16.mxu0 %v1254_v63 }
  0xe1   :  { %711 = vmatpush2.bf16.msra.mxu0 %v1252_v0  ;;  %v1425_v0 = vmov 1966171168  }
  0xe2   :  { %712 = vmatprep.subr.bf16.mxu0 %v1257_v1  ;;  %v423_v1 = vunpack.c.l.s4 %v1425_v0 }
  0xe5   :  { %713 = vmatpush2.bf16.msra.mxu0 %v1255_v2  ;;  %v424_v2 = vunpack.c.0.s8 %v423_v1 }
  0xe6   :  { %714 = vmatprep.subr.bf16.mxu0 %v1260_v3 }
  0xe9   :  { %715 = vmatpush2.bf16.msra.mxu0 %v1258_v4  ;;  %v1547_v4 = vsub.s32 %v424_v2, %v249_v15 }
  0xea   :  { %716 = vmatprep.subr.bf16.mxu0 %v1263_v5 }
  0xed   :  { %717 = vmatpush2.bf16.msra.mxu0 %v1261_v6 }
  0xee   :  { %718 = vmatprep.subr.bf16.mxu0 %v1266_v7 }
  0xf1   :  { %719 = vmatpush2.bf16.msra.mxu0 %v1264_v8  ;;  %v414_v8 = vld [vmem:[%s1594_s4] sm:$0x3] }
  0xf2   :  { %720 = vmatprep.subr.bf16.mxu0 %v1269_v9 }
  0xf5   :  { %721 = vmatpush2.bf16.msra.mxu0 %v1267_v10 }
  0xf6   :  { %722 = vmatprep.subr.bf16.mxu0 %v1272_v11 }
  0xf9   :  { %723 = vmatpush2.bf16.msra.mxu0 %v1270_v12 }
  0xfa   :  { %724 = vmatprep.subr.bf16.mxu0 %v1275_v13 }
  0xfd   :  { %725 = vmatpush2.bf16.msra.mxu0 %v1273_v14 }
 0x180   :  { %v223_v42 = vpop.f32.mrf.mxu0 }
 0x181   :  { %v229_v43 = vpack.c.bf16 %v223_v42, %v223_v42 }
 0x182   :  { %v1175_v44 = vpop.f32.mrf.mxu0 }
 0x183   :  { %371 = vmatmul.mubr.bf16.vlgmr.msra.gmra.mxu1 %v229_v43 }
 0x184   :  { %v226_v45 = vpop.f32.mrf.mxu0 }
 0x186   :  { %v1176_v46 = vpop.f32.mrf.mxu0 }
 0x243   :  { %v372_v21 = vpop.f32.mrf.mxu1 }
 0x244   :  { %v1541_v22 = vadd.f32 %v372_v21, %v251_v19  ;;  %v438_v19 = vld [vmem:[%s1595_s5] sm:$0x3] }
 0x245   :  { %v374_v23 = vpop.f32.mrf.mxu1 }
 0x246   :  { %v379_v24 = vrot.slane %v1541_v22, 4  ;;  %v394_v25 = vmul.f32 %v1541_v22, %v1541_v22  ;;  %v375_v26 = vadd.f32 %v374_v23, %v255_v20 }
 0x247   :  { %v376_v27 = vpop.f32.mrf.mxu1 }
 0x248   :  { %v380_v28 = vadd.f32 %v379_v24, %v1541_v22  ;;  %v396_v29 = vrot.slane %v394_v25, 4  ;;  %v385_v30 = vrot.slane %v375_v26, 4  ;;  %v395_v32 = vmul.f32 %v375_v26, %v375_v26 }
 0x249   :  { %v377_v33 = vpop.f32.mrf.mxu1 }
 0x24a   :  { %v381_v34 = vrot.slane %v380_v28, 2  ;;  %v397_v35 = vadd.f32 %v396_v29, %v394_v25  ;;  %v386_v36 = vadd.f32 %v385_v30, %v375_v26  ;;  %v402_v37 = vrot.slane %v395_v32, 4 }
 0x24c   :  { %v382_v38 = vadd.f32 %v381_v34, %v380_v28  ;;  %v398_v39 = vrot.slane %v397_v35, 2  ;;  %v387_v40 = vrot.slane %v386_v36, 2  ;;  %v403_v41 = vadd.f32 %v402_v37, %v395_v32  ;;  %v1278_v37 = vld [vmem:[#allocation8 + $0x70] sm:$0xff]  }
 0x24e   :  { %v383_v42 = vrot.slane %v382_v38, 1  ;;  %v399_v43 = vadd.f32 %v398_v39, %v397_v35  ;;  %v388_v44 = vadd.f32 %v387_v40, %v386_v36  ;;  %v404_v45 = vrot.slane %v403_v41, 2  ;;  %v1276_v35 = vld [vmem:[#allocation8 + $0x78] sm:$0xff]   ;;  %v1282_v39 = vld [vmem:[#allocation8 + $0x60] sm:$0xff]  }
 0x24f   :  { %v1277_v36 = vld [vmem:[#allocation8 + $0x38] sm:$0xff]   ;;  %1135 = vmatprep.subr.bf16.mxu1 %v1276_v35  ;;  %v1283_v40 = vld [vmem:[#allocation8 + $0x20] sm:$0xff]  }
 0x250   :  { %v384_v46 = vadd.f32 %v383_v42, %v382_v38  ;;  %v400_v47 = vrot.slane %v399_v43, 1  ;;  %v389_v48 = vrot.slane %v388_v44, 1  ;;  %v405_v49 = vadd.f32 %v404_v45, %v403_v41  ;;  %1136 = vmatpush3.bf16.msra.mxu1 %v1277_v36  ;;  %v1280_v38 = vld [vmem:[#allocation8 + $0x68] sm:$0xff]   ;;  %v1284_v41 = vld [vmem:[#allocation8 + $0x58] sm:$0xff]  }
 0x251   :  { %1137 = vmatprep.subr.bf16.mxu1 %v1278_v37  ;;  %v1285_v42 = vld [vmem:[#allocation8 + $0x18] sm:$0xff]   ;;  %v1288_v45 = vld [vmem:[#allocation8 + $0x48] sm:$0xff]  }
 0x252   :  { %v392_v50 = vmul.f32 0.125, %v384_v46  ;;  %v401_v51 = vadd.f32 %v400_v47, %v399_v43  ;;  %v390_v52 = vadd.f32 %v389_v48, %v388_v44  ;;  %v406_v53 = vrot.slane %v405_v49, 1  ;;  %v1286_v43 = vld [vmem:[#allocation8 + $0x50] sm:$0xff]   ;;  %v1289_v46 = vld [vmem:[#allocation8 + $0x8] sm:$0xff]   ;;  %v1290_v47 = vld [vmem:[#allocation8 + $0x40] sm:$0xff]  }
 0x253   :  { %v1287_v44 = vld [vmem:[#allocation8 + $0x10] sm:$0xff]   ;;  %v1291_v48 = vld [vmem:[#allocation8] sm:$0xff]  }
 0x254   :  { %v408_v54 = vmul.f32 0.125, %v401_v51  ;;  %v410_v55 = vmul.f32 %v392_v50, %v392_v50  ;;  %v407_v56 = vadd.f32 %v406_v53, %v405_v49  ;;  %v393_v57 = vmul.f32 0.125, %v390_v52  ;;  %v522_v49 = vld [vmem:[%s1597_s7] sm:$0x3] }
 0x255   :  { %v531_v51 = vrot.slane %v522_v49, %v1537_v18 }
 0x256   :  { %v412_v58 = vsub.f32 %v408_v54, %v410_v55  ;;  %v409_v59 = vmul.f32 0.125, %v407_v56  ;;  %v411_v60 = vmul.f32 %v393_v57, %v393_v57 }
 0x258   :  { %v415_v61 = vadd.f32 1e-05, %v412_v58  ;;  %v413_v62 = vsub.f32 %v409_v59, %v411_v60 }
 0x25a   :  { %v416_v63 = vadd.f32 1e-05, %v413_v62  ;;  %1292 = vrsqrt.f32 %v415_v61 }
 0x25c   :  { %1294 = vrsqrt.f32 %v416_v63 }
 0x267   :  { %v1293_v3 = vpop.eup %1292 }
 0x269   :  { %v1295_v5 = vpop.eup %1294 }
 0x26a   :  { %v421_v6 = vcombine.low %v1293_v3, %v1295_v5 }
 0x26c   :  { %v428_v7 = vrot.slane %v421_v6, %v1547_v4 }
 0x26e   :  { %v435_v9 = vrot.slane %v428_v7, %v1547_v4 }
 0x270   :  { %v437_v10 = vmul.f32 %v435_v9, %v414_v8 }
 0x272   :  { %v443_v11 = vrot.slane %v437_v10, %v1532_v16  ;;  %v447_v12 = vrot.slane %v437_v10, %v1537_v18 }
 0x274   :  { %v450_v13 = vmul.f32 %v443_v11, %v392_v50  ;;  %v451_v14 = vmul.f32 %v447_v12, %v393_v57  ;;  %v472_v23 = vmul.f32 %v447_v12, %v375_v26  ;;  %v471_v25 = vmul.f32 %v443_v11, %v1541_v22  ;;  %v1279_v26 = vld [vmem:[#allocation8 + $0x30] sm:$0xff]   ;;  %v1281_v22 = vld [vmem:[#allocation8 + $0x28] sm:$0xff]  }
 0x275   :  { %1138 = vmatpush3.bf16.msra.mxu1 %v1279_v26  ;;  %v527_v50 = vrot.slane %v522_v49, %v1532_v16 }
 0x276   :  { %v454_v17 = vcombine.low %v450_v13, %v451_v14  ;;  %1139 = vmatprep.subr.bf16.mxu1 %v1280_v38 }
 0x278   :  { %v461_v15 = vrot.slane %v454_v17, %v1547_v4 }
 0x279   :  { %1140 = vmatpush3.bf16.msra.mxu1 %v1281_v22  ;;  %v769_v22 = vld [vmem:[%s1598_s8] sm:$0x3] }
 0x27a   :  { %v468_v20 = vrot.slane %v461_v15, %v1547_v4  ;;  %1141 = vmatprep.subr.bf16.mxu1 %v1282_v39 }
 0x27c   :  { %v470_v21 = vsub.f32 %v438_v19, %v468_v20 }
 0x27d   :  { %1142 = vmatpush3.bf16.msra.mxu1 %v1283_v40 }
 0x27e   :  { %v481_v24 = vrot.slane %v470_v21, %v1537_v18  ;;  %v477_v27 = vrot.slane %v470_v21, %v1532_v16  ;;  %1143 = vmatprep.subr.bf16.mxu1 %v1284_v41 }
 0x280   :  { %v485_v28 = vadd.f32 %v481_v24, %v472_v23  ;;  %v484_v29 = vadd.f32 %v477_v27, %v471_v25 }
 0x281   :  { %1144 = vmatpush3.bf16.msra.mxu1 %v1285_v42 }
 0x282   :  { %v487_v30 = vmax.f32 %v485_v28, 0.0  ;;  %v486_v32 = vmax.f32 %v484_v29, 0.0  ;;  %1145 = vmatprep.subr.bf16.mxu1 %v1286_v43 }
 0x284   :  { %v489_v33 = vpack.c.bf16 %v487_v30, %v487_v30  ;;  %v488_v34 = vpack.c.bf16 %v486_v32, %v486_v32 }
 0x285   :  { %1146 = vmatpush3.bf16.msra.mxu1 %v1287_v44 }
 0x286   :  { %726 = vmatprep.mubr.bf16.mxu0 %v489_v33  ;;  %1147 = vmatprep.subr.bf16.mxu1 %v1288_v45 }
 0x287   :  { %727 = vmatmul.mubr.bf16.vlgmr.msra.gmra.mxu0 %v488_v34 }
 0x289   :  { %1148 = vmatpush3.bf16.msra.mxu1 %v1289_v46 }
 0x28a   :  { %1149 = vmatprep.subr.bf16.mxu1 %v1290_v47  ;;  %v793_v47 = vld [vmem:[%s1599_s9] sm:$0x3] }
 0x28d   :  { %1150 = vmatpush3.bf16.msra.mxu1 %v1291_v48 }
 0x347   :  { %v728_v52 = vpop.f32.mrf.mxu0 }
 0x348   :  { %v729_v53 = vadd.f32 %v728_v52, %v527_v50 }
 0x349   :  { %v730_v54 = vpop.f32.mrf.mxu0 }
 0x34a   :  { %v735_v55 = vrot.slane %v729_v53, 4  ;;  %v749_v56 = vmul.f32 %v729_v53, %v729_v53  ;;  %v731_v57 = vadd.f32 %v730_v54, %v531_v51 }
 0x34b   :  { %v732_v58 = vpop.f32.mrf.mxu0 }
 0x34c   :  { %v736_v59 = vadd.f32 %v735_v55, %v729_v53  ;;  %v751_v60 = vrot.slane %v749_v56, 4  ;;  %v741_v61 = vrot.slane %v731_v57, 4  ;;  %v750_v62 = vmul.f32 %v731_v57, %v731_v57 }
 0x34d   :  { %v733_v63 = vpop.f32.mrf.mxu0 }
 0x34e   :  { %v737_v0 = vrot.slane %v736_v59, 2  ;;  %v752_v1 = vadd.f32 %v751_v60, %v749_v56  ;;  %v742_v2 = vadd.f32 %v741_v61, %v731_v57  ;;  %v757_v3 = vrot.slane %v750_v62, 4 }
 0x350   :  { %v738_v5 = vadd.f32 %v737_v0, %v736_v59  ;;  %v753_v6 = vrot.slane %v752_v1, 2  ;;  %v743_v7 = vrot.slane %v742_v2, 2  ;;  %v758_v8 = vadd.f32 %v757_v3, %v750_v62 }
 0x352   :  { %v739_v9 = vrot.slane %v738_v5, 1  ;;  %v754_v10 = vadd.f32 %v753_v6, %v752_v1  ;;  %v744_v11 = vadd.f32 %v743_v7, %v742_v2  ;;  %v759_v12 = vrot.slane %v758_v8, 2 }
 0x354   :  { %v740_v13 = vadd.f32 %v739_v9, %v738_v5  ;;  %v755_v14 = vrot.slane %v754_v10, 1  ;;  %v745_v17 = vrot.slane %v744_v11, 1  ;;  %v760_v15 = vadd.f32 %v759_v12, %v758_v8 }
 0x356   :  { %v747_v19 = vmul.f32 0.125, %v740_v13  ;;  %v756_v20 = vadd.f32 %v755_v14, %v754_v10  ;;  %v746_v21 = vadd.f32 %v745_v17, %v744_v11  ;;  %v761_v23 = vrot.slane %v760_v15, 1 }
 0x358   :  { %v763_v24 = vmul.f32 0.125, %v756_v20  ;;  %v765_v25 = vmul.f32 %v747_v19, %v747_v19  ;;  %v762_v27 = vadd.f32 %v761_v23, %v760_v15  ;;  %v748_v28 = vmul.f32 0.125, %v746_v21 }
 0x35a   :  { %v767_v29 = vsub.f32 %v763_v24, %v765_v25  ;;  %v764_v30 = vmul.f32 0.125, %v762_v27  ;;  %v766_v32 = vmul.f32 %v748_v28, %v748_v28 }
 0x35c   :  { %v770_v33 = vadd.f32 1e-05, %v767_v29  ;;  %v768_v34 = vsub.f32 %v764_v30, %v766_v32 }
 0x35e   :  { %v771_v35 = vadd.f32 1e-05, %v768_v34  ;;  %1296 = vrsqrt.f32 %v770_v33 }
 0x360   :  { %1298 = vrsqrt.f32 %v771_v35 }
 0x36b   :  { %v1297_v36 = vpop.eup %1296 }
 0x36d   :  { %v1299_v37 = vpop.eup %1298 }
 0x36e   :  { %v776_v26 = vcombine.low %v1297_v36, %v1299_v37 }
 0x370   :  { %v783_v38 = vrot.slane %v776_v26, %v1547_v4 }
 0x372   :  { %v790_v39 = vrot.slane %v783_v38, %v1547_v4 }
 0x374   :  { %v792_v40 = vmul.f32 %v790_v39, %v769_v22 }
 0x376   :  { %v798_v41 = vrot.slane %v792_v40, %v1532_v16  ;;  %v802_v42 = vrot.slane %v792_v40, %v1537_v18 }
 0x378   :  { %v805_v43 = vmul.f32 %v798_v41, %v747_v19  ;;  %v806_v44 = vmul.f32 %v802_v42, %v748_v28  ;;  %v827_v50 = vmul.f32 %v802_v42, %v731_v57  ;;  %v826_v52 = vmul.f32 %v798_v41, %v729_v53 }
 0x37a   :  { %v809_v45 = vcombine.low %v805_v43, %v806_v44 }
 0x37c   :  { %v816_v46 = vrot.slane %v809_v45, %v1547_v4 }
 0x37e   :  { %v823_v48 = vrot.slane %v816_v46, %v1547_v4  ;;  %v1109_v4 = vld [vmem:[%s1601_s11] ss:$0 sm:$0xff]  ;;  %s1384_s11 = scalar_lea.vmem %s1040_s15, 128 }
 0x37f   :  { %p1385_p6 = scmp.ne.s32.totalorder %s1040_s15, %s1384_s11  ;;  %p1390_p8 = scmp.lt.s32.totalorder %s1384_s11, %s1384_s11 }
 0x380   :  { %v825_v49 = vsub.f32 %v793_v47, %v823_v48 }
 0x381   :  { %p1391_p9 = por %p1390_p8, %p1389_p7 }
 0x382   :  { %v836_v51 = vrot.slane %v825_v49, %v1537_v18  ;;  %v832_v54 = vrot.slane %v825_v49, %v1532_v16 }
 0x383   :  { %p1392_p10 = pnand %p1391_p9, %p1385_p6 }
 0x384   :  { %v840_v55 = vadd.f32 %v836_v51, %v827_v50  ;;  %v839_v56 = vadd.f32 %v832_v54, %v826_v52 }
 0x386   :  { %v842_v58 = vmax.f32 %v840_v55, 0.0  ;;  %v841_v59 = vmax.f32 %v839_v56, 0.0 }
 0x388   :  { %v844_v60 = vpack.c.bf16 %v842_v58, %v842_v58  ;;  %v843_v61 = vpack.c.bf16 %v841_v59, %v841_v59 }
 0x38a   :  { %1012 = vmatprep.mubr.bf16.mxu1 %v844_v60 }
 0x38b   :  { %1013 = vmatmul.mubr.bf16.vlgmr.msra.gmra.mxu1 %v843_v61 }
 0x44b   :  { %v1151_v62 = vpop.f32.mrf.mxu1 }
 0x44d   :  { %v1152_v63 = vpop.f32.mrf.mxu1 }
 0x44e   :  { %v1153_v57 = vadd.f32 %v1152_v63, %v1151_v62 }
 0x44f   :  { %v1154_v0 = vpop.f32.mrf.mxu1 }
 0x450   :  { %v1015_v18 = vadd.f32 %v1153_v57, %v1109_v4 }
 0x451   :  { %v1155_v16 = vpop.f32.mrf.mxu1 }
 0x452   :  { %v1021_v53 = vsel %vm1020_vm4, %v1015_v18, -1e+30 }
 0x453   :  { %1022 = vmax.xlane.f32.xlu1 %v1021_v53 }
 0x4dc   :  { %v1023_v1 = vpop.xlane.xlu1 %1022 }
 0x4dd   :  { %v1024_v2 = vsub.f32 %v1021_v53, %v1023_v1 }
 0x4df   :  { %v1025_v3 = vmul.f32 1.442695, %v1024_v2 }
 0x4e1   :  { %1300 = vpow2.f32 %v1025_v3 }
 0x4ee   :  { %v1301_v5 = vpop.eup %1300 }
 0x4ef   :  { %v1027_v6 = vsel %vm1020_vm4, %v1301_v5, 0.0 }
 0x4f0   :  { %1028 = vadd.xlane.f32.xlu0 %v1027_v6 }
 0x579   :  { %v1029_v7 = vpop.xlane.xlu0 %1028 }
 0x57a   :  { %1302 = vrcp.f32 %v1029_v7 }
 0x587   :  { %v1303_v8 = vpop.eup %1302 }
 0x588   :  { %v1031_v9 = vmul.f32 %v1303_v8, %v1027_v6 }
 0x58a   :  { %1032 = vst [vmem:[#allocation10] sm:$0xff] %v1031_v9 }
 0x58b   :  { %1395 = shalt.err (!%p1392_p10)
}
 0x58c   :  { %1042 = dma.vmem_to_hbm [thread:$0]  %s1040_s15, 128, %s1602_s12, [#allocation4]  }
 0x58d   :  { %1410 = dma.done.wait [#allocation4], 128  }
 0x58e   :  { %1411 = vsyncadd [#allocation4], 4294967168 }
 0x58f   :  { %1046 = vsyncpa [#allocation3], 1 }
 0x590   :  { %1047 = vsyncpa [#allocation6], 1 }
 0x591   :  { %1048 = vsyncpa [#allocation9], 1 }
 0x592   :  { %1049 = vsyncpa [#allocation4], 1 }

</bundles_post_ra>
